<compile_context>
chip_gen: v6e
topology: v6e:2x2x1
jax: 0.10.0
libtpu: 0.0.40
codegen_flags: <defaults>
</compile_context>

<pallas_src>
import math

import jax
import jax.numpy as jnp
from jax.experimental import pallas as pl
from jax.experimental.pallas import tpu as pltpu


def _dg_sample_kernel(mean_ref, logvar_ref, noise_ref, o_ref):
    mean = mean_ref[...].astype(jnp.float32)
    logvar = logvar_ref[...].astype(jnp.float32)
    noise = noise_ref[...].astype(jnp.float32)
    std = jnp.exp(0.5 * logvar)                     # EUP transcendental
    o_ref[...] = (mean + std * noise).astype(o_ref.dtype)


def _dg_mean_kernel(mean_ref, o_ref):
    o_ref[...] = mean_ref[...].astype(o_ref.dtype)


def _pick_tile_rows(r):
    # Largest power-of-two row tile (multiple of 8) that divides r, capped so
    # a double-buffered set of 4 f32 tiles stays well under scoped VMEM.
    for cand in (1024, 512, 256, 128, 64, 32, 16, 8):
        if r % cand == 0:
            return cand
    return r  # full-extent block: (8,128) divisibility rule doesn't apply


def diagonal_gaussian(z, noise=None, *, sample=True, chunk_dim=1):
    """Pallas implementation of DiagonalGaussian.forward.

    z:     array whose `chunk_dim` axis holds [mean ; logvar] stacked (size 2*C).
    noise: standard-normal array with the shape of `mean` (required if sample).
    """
    shape = z.shape
    assert shape[chunk_dim] % 2 == 0, "chunk axis must be even (mean|logvar)"
    pre = int(math.prod(shape[:chunk_dim]))
    half = shape[chunk_dim] // 2
    post = int(math.prod(shape[chunk_dim + 1:]))
    mh = half * post                                   # elements per (batch, half)
    out_shape = shape[:chunk_dim] + (half,) + shape[chunk_dim + 1:]

    # (pre, 2, mh) view: [:, 0, :] == mean, [:, 1, :] == logvar.
    # chunk() halves along chunk_dim are contiguous, so this is reshape-only.
    z3 = z.reshape(pre, 2, mh)

    # Pad the flattened per-half length up to a lane multiple (rare fallback).
    mh_pad = ((mh + 127) // 128) * 128
    if mh_pad != mh:
        z3 = jnp.pad(z3, ((0, 0), (0, 0), (0, mh_pad - mh)))
    r = mh_pad // 128
    tile_r = _pick_tile_rows(r)
    z4 = z3.reshape(pre, 2, r, 128)

    grid = (pre, r // tile_r)
    cparams = pltpu.CompilerParams(
        dimension_semantics=("parallel", "parallel"),
    )
    mean_spec = pl.BlockSpec((None, None, tile_r, 128), lambda b, t: (b, 0, t, 0))
    out_spec = pl.BlockSpec((None, tile_r, 128), lambda b, t: (b, t, 0))

    if sample:
        if noise is None:
            raise ValueError("sample=True requires a noise array shaped like mean")
        assert noise.shape == out_shape, (noise.shape, out_shape)
        n2 = noise.reshape(pre, mh)
        if mh_pad != mh:
            n2 = jnp.pad(n2, ((0, 0), (0, mh_pad - mh)))
        n4 = n2.reshape(pre, r, 128)

        logvar_spec = pl.BlockSpec((None, None, tile_r, 128), lambda b, t: (b, 1, t, 0))
        noise_spec = pl.BlockSpec((None, tile_r, 128), lambda b, t: (b, t, 0))

        out4 = pl.pallas_call(
            _dg_sample_kernel,
            out_shape=jax.ShapeDtypeStruct((pre, r, 128), z.dtype),
            grid_spec=pltpu.PrefetchScalarGridSpec(
                num_scalar_prefetch=0,
                grid=grid,
                in_specs=[mean_spec, logvar_spec, noise_spec],
                out_specs=out_spec,
            ),
            compiler_params=cparams,
        )(z4, z4, n4)   # same buffer twice; index_maps select the mean / logvar halves
    else:
        out4 = pl.pallas_call(
            _dg_mean_kernel,
            out_shape=jax.ShapeDtypeStruct((pre, r, 128), z.dtype),
            grid_spec=pltpu.PrefetchScalarGridSpec(
                num_scalar_prefetch=0,
                grid=grid,
                in_specs=[mean_spec],
                out_specs=out_spec,
            ),
            compiler_params=cparams,
        )(z4)

    out = out4.reshape(pre, mh_pad)[:, :mh]
    return out.reshape(out_shape)


def _reference(z, noise, sample=True, chunk_dim=1):
    mean, logvar = jnp.split(z, 2, axis=chunk_dim)
    if sample:
        std = jnp.exp(0.5 * logvar.astype(jnp.float32))
        return (mean.astype(jnp.float32) + std * noise.astype(jnp.float32)).astype(z.dtype)
    return mean


if __name__ == "__main__":
    key = jax.random.PRNGKey(0)
    k_z, k_n = jax.random.split(key)

    # z carries [mean ; logvar] along the channel axis: (N, 2*C, H, W)
    N, C, H, W = 2, 4, 16, 16
    z = jax.random.normal(k_z, (N, 2 * C, H, W), dtype=jnp.float32)
    # TODO(synk): torch.randn_like uses torch's global RNG; here the standard
    # normal noise is generated deterministically in JAX and passed in (an
    # in-kernel pltpu PRNG variant would save one HBM read but is not
    # bit-reproducible against a pure-JAX reference).
    noise = jax.random.normal(k_n, (N, C, H, W), dtype=jnp.float32)

    out = diagonal_gaussian(z, noise, sample=True, chunk_dim=1)
    out = jax.block_until_ready(out)
    ref = _reference(z, noise, sample=True, chunk_dim=1)
    assert out.shape == (N, C, H, W), out.shape
    assert jnp.allclose(out, ref, atol=1e-5, rtol=1e-5), "sample path mismatch"

    out_mean = jax.block_until_ready(diagonal_gaussian(z, sample=False, chunk_dim=1))
    ref_mean = _reference(z, noise, sample=False, chunk_dim=1)
    assert out_mean.shape == (N, C, H, W)
    assert jnp.allclose(out_mean, ref_mean, atol=1e-6, rtol=1e-6), "mean path mismatch"

    print("KERNEL_OK")
</pallas_src>

<mosaic_0001>
module attributes {stable_mosaic.version = 11 : i64} {
  func.func @_dg_sample_kernel(%arg0: i32, %arg1: i32, %arg2: memref<1x1x8x128xf32, #tpu.memory_space<vmem>>, %arg3: memref<1x1x8x128xf32, #tpu.memory_space<vmem>>, %arg4: memref<1x8x128xf32, #tpu.memory_space<vmem>>, %arg5: memref<1x8x128xf32, #tpu.memory_space<vmem>>) attributes {dimension_semantics = [#tpu.dimension_semantics<parallel>, #tpu.dimension_semantics<parallel>], iteration_bounds = array<i64: 2, 1>, scalar_prefetch = 0 : i64, scratch_operands = 0 : i64, tpu.core_type = #tpu.core_type<tc>, window_params = [{transform_indices = @transform_0, window_bounds = array<i64: 1, 1, 8, 128>}, {transform_indices = @transform_1, window_bounds = array<i64: 1, 1, 8, 128>}, {transform_indices = @transform_2, window_bounds = array<i64: 1, 8, 128>}, {transform_indices = @transform_3, window_bounds = array<i64: 1, 8, 128>}]} {
    %c0 = arith.constant 0 : index
    %c0_0 = arith.constant 0 : index
    %c0_1 = arith.constant 0 : index
    %c0_2 = arith.constant 0 : index
    %0 = vector.load %arg2[%c0, %c0_0, %c0_1, %c0_2] : memref<1x1x8x128xf32, #tpu.memory_space<vmem>>, vector<1x1x8x128xf32>
    %1 = vector.shape_cast %0 : vector<1x1x8x128xf32> to vector<8x128xf32>
    %c0_3 = arith.constant 0 : index
    %c0_4 = arith.constant 0 : index
    %c0_5 = arith.constant 0 : index
    %c0_6 = arith.constant 0 : index
    %2 = vector.load %arg3[%c0_3, %c0_4, %c0_5, %c0_6] : memref<1x1x8x128xf32, #tpu.memory_space<vmem>>, vector<1x1x8x128xf32>
    %3 = vector.shape_cast %2 : vector<1x1x8x128xf32> to vector<8x128xf32>
    %c0_7 = arith.constant 0 : index
    %c0_8 = arith.constant 0 : index
    %c0_9 = arith.constant 0 : index
    %4 = vector.load %arg4[%c0_7, %c0_8, %c0_9] : memref<1x8x128xf32, #tpu.memory_space<vmem>>, vector<1x8x128xf32>
    %5 = vector.shape_cast %4 : vector<1x8x128xf32> to vector<8x128xf32>
    %cst = arith.constant 5.000000e-01 : f32
    %6 = vector.broadcast %cst : f32 to vector<8x128xf32>
    %7 = arith.mulf %6, %3 : vector<8x128xf32>
    %8 = math.exp %7 : vector<8x128xf32>
    %9 = arith.mulf %8, %5 : vector<8x128xf32>
    %10 = arith.addf %1, %9 : vector<8x128xf32>
    %c0_10 = arith.constant 0 : index
    %c0_11 = arith.constant 0 : index
    %c0_12 = arith.constant 0 : index
    %11 = vector.load %arg5[%c0_10, %c0_11, %c0_12] : memref<1x8x128xf32, #tpu.memory_space<vmem>>, vector<1x8x128xf32>
    %12 = vector.shape_cast %11 : vector<1x8x128xf32> to vector<8x128xf32>
    %13 = vector.shape_cast %10 : vector<8x128xf32> to vector<1x8x128xf32>
    tpu.vector_store %arg5[%c0_10, %c0_11, %c0_12], %13 {strides = array<i32>} : memref<1x8x128xf32, #tpu.memory_space<vmem>>, vector<1x8x128xf32>,
    return
  }
  func.func @transform_0(%arg0: i32, %arg1: i32) -> (i32, i32, i32, i32) {
    %c0_i32 = arith.constant 0 : i32
    %c0_i32_0 = arith.constant 0 : i32
    %c0_i32_1 = arith.constant 0 : i32
    return %arg0, %c0_i32, %arg1, %c0_i32_0 : i32, i32, i32, i32
  }
  func.func @transform_1(%arg0: i32, %arg1: i32) -> (i32, i32, i32, i32) {
    %c1_i32 = arith.constant 1 : i32
    %c0_i32 = arith.constant 0 : i32
    %c0_i32_0 = arith.constant 0 : i32
    return %arg0, %c1_i32, %arg1, %c0_i32 : i32, i32, i32, i32
  }
  func.func @transform_2(%arg0: i32, %arg1: i32) -> (i32, i32, i32) {
    %c0_i32 = arith.constant 0 : i32
    %c0_i32_0 = arith.constant 0 : i32
    return %arg0, %arg1, %c0_i32 : i32, i32, i32
  }
  func.func @transform_3(%arg0: i32, %arg1: i32) -> (i32, i32, i32) {
    %c0_i32 = arith.constant 0 : i32
    %c0_i32_0 = arith.constant 0 : i32
    return %arg0, %arg1, %c0_i32 : i32, i32, i32
  }
}

</mosaic_0001>

<bundles_post_ra>
// kernel: tpu_custom_call.1
= control target key start
LH: loop header
LB: loop body
LE: loop exit
PB: predicated region body
PF: predicated region fallthrough
CT: control target
= control target key end

     0   :  { %s908_s0 = inlined_call_operand.hbm [shape: f32[2,2,8,128], index: 0, kind: input, shape index: {}]   ;;  %s909_s1 = inlined_call_operand.hbm [shape: f32[2,2,8,128], index: 1, kind: input, shape index: {}]   ;;  %s910_s2 = inlined_call_operand.hbm [shape: f32[2,8,128], index: 2, kind: input, shape index: {}]   ;;  %s911_s3 = inlined_call_operand.hbm [shape: f32[2,8,128], index: 3, kind: output, shape index: {}]  }
   0x1   :  { %912 = sst [smem:[#allocation12_spill]] %s908_s0 }
   0x2   :  { %913 = sst [smem:[#allocation13_spill]] %s909_s1 }
   0x3   :  { %8 = vsyncpa [#allocation3], 0 }
   0x4   :  { %10 = vsyncpa [#allocation3 + $0x1], 0 }
   0x5   :  { %11 = vsyncpa [#allocation6], 0 }
   0x6   :  { %13 = vsyncpa [#allocation6 + $0x1], 0 }
   0x7   :  { %14 = vsyncpa [#allocation4], 0 }
   0x8   :  { %16 = vsyncpa [#allocation4 + $0x1], 0  ;;  %s727_s12 = smov 0   ;;  %s729_s13 = smov 0  }
   0x9   :  { %s731_s14 = smov 0   ;;  %s733_s15 = smov 0  }
   0xa   :  { %s735_s16 = smov 0   ;;  %s737_s17 = smov 0  }
   0xb LB: > { %s758_s18 = sadd.s32 4294967295, %s701_s17   ;;  %s436_s19 = sadd.s32 4294967294, %s701_s17   ;;  %s701_s17 = sphi %s737_s17, %s22_s17   ;;  %s697_s16 = sphi %s735_s16, %s927_s16   ;;  %s693_s15 = sphi %s733_s15, %s926_s15   ;;  %s689_s14 = sphi %s731_s14, %s925_s14   ;;  %s685_s13 = sphi %s729_s13, %s924_s13   ;;  %s681_s12 = sphi %s727_s12, %s923_s12  }
   0xc   : > { %s34_s20 = sadd.s32 1, %s697_s16  ;;  %s43_s21 = sadd.s32 1, %s689_s14 }
   0xd   : > { %p36_p0 = scmp.ge.s32.totalorder %s34_s20, 2  ;;  %p50_p1 = scmp.ne.s32.totalorder %s689_s14, %s685_s13 }
   0xe   : > { %p51_p2 = scmp.eq.s32.totalorder %s701_s17, 0  ;;  %p56_p3 = scmp.ne.s32.totalorder %s685_s13, %s681_s12 }
   0xf   : > { %s929_s20 = smov (%p36_p0, %s34_s20), 0  ;;  %p57_p5 = scmp.eq.s32.totalorder %s758_s18, 0 }
  0x10   : > { %p770_p4 = por %p51_p2, %p50_p1  ;;  %s38_s23 = ssub.s32 %s697_s16, %s929_s20 }
  0x11   : > { %p138_p6 = scmp.eq.s32.totalorder %s758_s18, 1  ;;  %p41_p7 = scmp.eq.s32.totalorder %s38_s23, 0 }
  0x12   : > { %p778_p8 = por %p57_p5, %p56_p3  ;;  %p144_p10 = scmp.eq.s32.totalorder %s436_s19, 1 }
  0x13   : > { %p782_p9 = por %p138_p6, %p50_p1  ;;  %p480_p13 = scmp.lt.s32.totalorder %s701_s17, 2 }
  0x14   : > { %s787_s26 = scalar_select %p41_p7, %s689_s14, %s43_s21  }
  0x15   : > { %p789_p11 = por %p144_p10, %p56_p3  ;;  %s164_s28 = sand.u32 1, %s689_s14  }
  0x16   : > { %s798_s29 = sshll.u32 %s164_s28, 3  ;;  %s456_s30 = sshll.u32 %s697_s16, 8 }
  0x17   : > { %p803_p0 = pnand %p480_p13, %p770_p4  ;;  %s184_s5 = sand.u32 1, %s701_s17  }
  0x18   : > { %s919_s1 = sld [smem:[#allocation13_spill]]  ;;  %s188_s10 = scalar_lea.vmem [#allocation5], %s798_s29 }
  0x19   : > { %s198_s11 = sshll.u32 %s188_s10, 4  ;;  %p447_p1 = scmp.ge.s32.totalorder %s701_s17, 1  ;;  %s199_s11 = int_to_ptr.vmem [resolvable:$true] %s198_s11 }
  0x1a   : > { %s813_s19 = scalar_lea.sflag [#allocation6], %s184_s5  ;;  %p534_p2 = pneg %p803_p0 }
  0x1b   : > { %s545_s21 = scalar_lea.vmem %s199_s11, 128  ;;  %s703_s22 = smov [#allocation5]  }
  0x1c   : > { %p546_p3 = scmp.ne.s32.totalorder %s199_s11, %s545_s21  ;;  %s550_s23 = sshll.u32 %s703_s22, 4  ;;  %s551_s23 = int_to_ptr.vmem [resolvable:$false] %s550_s23 }
  0x1d   : > { %s552_s6 = scalar_lea.vmem %s551_s23, 256  ;;  %p553_p6 = scmp.lt.s32.totalorder %s199_s11, %s551_s23 }
  0x1e   : > { %s347_s8 = scalar_lea.hbm %s919_s1, %s456_s30  ;;  %p548_p4 = pnand %p546_p3, %p534_p2 }
  0x1f   : > { %s348_s9 = scalar_lea.hbm %s347_s8, 128  ;;  %p554_p7 = scmp.lt.s32.totalorder %s552_s6, %s545_s21 }
  0x20   : > { %p549_p5 = pneg %p548_p4 }
  0x21   : > { %p555_p10 = por %p554_p7, %p553_p6 }
  0x23   : > { %p556_p13 = pnand %p555_p10, %p549_p5 }
  0x25   : > { %559 = shalt.err (!%p556_p13)
}
  0x26   : > { %472 = dma.hbm_to_vmem [thread:$0]  (!%p803_p0), %s348_s9, 128, %s199_s11, %s813_s19  }
  0x27   : > { %p222_p3 = scmp.lt.s32.totalorder %s701_s17, 3  ;;  %s921_s0 = sld [smem:[#allocation12_spill]] }
  0x28   : > { %s168_s21 = scalar_lea.vmem [#allocation2], %s798_s29  ;;  %s165_s23 = scalar_lea.sflag [#allocation3], %s164_s28 }
  0x29   : > { %p826_p4 = pnand %p447_p1, %p222_p3  ;;  %s177_s22 = sshll.u32 %s168_s21, 4  ;;  %s178_s22 = int_to_ptr.vmem [resolvable:$true] %s177_s22 }
  0x2a   : > { %s574_s6 = scalar_lea.vmem %s178_s22, 128  ;;  %s704_s9 = smov [#allocation2]  }
  0x2b   : > { %p575_p5 = scmp.ne.s32.totalorder %s178_s22, %s574_s6  ;;  %s579_s11 = sshll.u32 %s704_s9, 4  ;;  %s580_s11 = int_to_ptr.vmem [resolvable:$false] %s579_s11 }
  0x2c   : > { %s581_s1 = scalar_lea.vmem %s580_s11, 256  ;;  %p582_p1 = scmp.lt.s32.totalorder %s178_s22, %s580_s11 }
  0x2d   : > { %s175_s10 = scalar_lea.hbm %s921_s0, %s456_s30  ;;  %p577_p6 = pnand %p575_p5, %p534_p2 }
  0x2e   : > { %p583_p10 = scmp.lt.s32.totalorder %s581_s1, %s574_s6 }
  0x2f   : > { %p578_p7 = pneg %p577_p6 }
  0x30   : > { %p584_p13 = por %p583_p10, %p582_p1 }
  0x32   : > { %p585_p3 = pnand %p584_p13, %p578_p7 }
  0x34   : > { %588 = shalt.err (!%p585_p3)
}
  0x35   : > { %469 = dma.hbm_to_vmem [thread:$0]  (!%p803_p0), %s175_s10, 128, %s178_s22, %s165_s23  }
  0x36   : > { %s446_s28 = sshll.u32 %s697_s16, 7  ;;  %s209_s30 = scalar_lea.vmem [#allocation7], %s798_s29 }
  0x37   : > { %s217_s7 = sshll.u32 %s209_s30, 4  ;;  %s215_s9 = scalar_lea.hbm %s910_s2, %s446_s28  ;;  %s218_s7 = int_to_ptr.vmem [resolvable:$true] %s217_s7 }
  0x38   : > { %s602_s0 = scalar_lea.vmem %s218_s7, 128  ;;  %s705_s1 = smov [#allocation7]  }
  0x39   : > { %p603_p5 = scmp.ne.s32.totalorder %s218_s7, %s602_s0  ;;  %s607_s6 = sshll.u32 %s705_s1, 4  ;;  %s608_s6 = int_to_ptr.vmem [resolvable:$false] %s607_s6 }
  0x3a   : > { %s609_s11 = scalar_lea.vmem %s608_s6, 256  ;;  %p610_p1 = scmp.lt.s32.totalorder %s218_s7, %s608_s6 }
  0x3b   : > { %p605_p6 = pnand %p603_p5, %p534_p2  ;;  %p611_p10 = scmp.lt.s32.totalorder %s609_s11, %s602_s0 }
  0x3d   : > { %p606_p7 = pneg %p605_p6  ;;  %p612_p13 = por %p611_p10, %p610_p1 }
  0x3f   : > { %p613_p3 = pnand %p612_p13, %p606_p7 }
  0x41   : > { %616 = shalt.err (!%p613_p3)
}
  0x42   : > { %475 = dma.hbm_to_vmem [thread:$0]  (!%p803_p0), %s215_s9, 128, %s218_s7, %s813_s19  }
  0x43   : > { %226 = sbr.rel (%p826_p4) target bundleno = 112 (0x70), region = 32  ;;  %s855_s29 = sand.u32 (!%p826_p4), 1, %s685_s13  }
  0x44   : > { %s448_s10 = sshll.u32 (!%p826_p4), %s855_s29, 3  ;;  %s229_s22 = scalar_lea.sflag (!%p826_p4), [#allocation3], %s855_s29 }
  0x45   : > { %s232_s23 = scalar_lea.vmem (!%p826_p4), [#allocation2], %s448_s10 }
  0x48   : > { %668 = dma.done.wait (%p778_p8), %s229_s22, 128  }
  0x49   : > { %670 = vsyncadd (%p778_p8), %s229_s22, 4294967168  ;;  %s237_s0 = sand.u32 1, %s758_s18   ;;  %s241_s19 = scalar_lea.vmem [#allocation5], %s448_s10 }
  0x4a   : > { %s238_s4 = scalar_lea.sflag [#allocation6], %s237_s0 }
  0x4b   : > { %672 = dma.done.wait (%p778_p8), %s238_s4, 256  }
  0x4c   : > { %674 = vsyncadd (%p778_p8), %s238_s4, 4294967040  ;;  %v284_v0 = vld [vmem:[%s241_s19] sm:$0xff]  ;;  %s250_s5 = scalar_lea.vmem [#allocation7], %s448_s10  ;;  %v283_v5 = vld [vmem:[%s232_s23] sm:$0xff]  ;;  %s282_s28 = scalar_lea.vmem [#allocation8], %s448_s10 }
  0x4d   : > { %v286_v1 = vmul.f32 0.5, %v284_v0  ;;  %v285_v3 = vld [vmem:[%s250_s5] sm:$0xff]  ;;  %s307_s18 = sshll.u32 %s282_s28, 4  ;;  %s453_s30 = sshll.u32 %s693_s15, 7  ;;  %s308_s18 = int_to_ptr.vmem [resolvable:$true] %s307_s18 }
  0x4e   : > { %s305_s8 = scalar_lea.hbm %s911_s3, %s453_s30  ;;  %s293_s21 = scalar_lea.sflag [#allocation4], %s855_s29 }
  0x4f   : > { %v287_v2 = vmul.f32 1.442695, %v286_v1  ;;  %s617_s9 = scalar_lea.vmem %s308_s18, 128  ;;  %s706_s1 = smov [#allocation8]  }
  0x50   : > { %p618_p8 = scmp.ne.s32.totalorder %s308_s18, %s617_s9  ;;  %s621_s6 = sshll.u32 %s706_s1, 4  ;;  %s622_s6 = int_to_ptr.vmem [resolvable:$false] %s621_s6 }
  0x51   : > { %530 = vpow2.f32 %v287_v2  ;;  %s623_s11 = scalar_lea.vmem %s622_s6, 256  ;;  %p624_p4 = scmp.lt.s32.totalorder %s308_s18, %s622_s6 }
  0x52   : > { %p619_p0 = pnand %p618_p8, %p782_p9  ;;  %p625_p5 = scmp.lt.s32.totalorder %s623_s11, %s617_s9 }
  0x54   : > { %p620_p2 = pneg %p619_p0  ;;  %p626_p6 = por %p625_p5, %p624_p4 }
  0x56   : > { %p627_p7 = pnand %p626_p6, %p620_p2 }
  0x5e   : > { %v531_v4 = vpop.eup %530 }
  0x5f   : > { %v289_v6 = vmul.f32 %v531_v4, %v285_v3 }
  0x61   : > { %v290_v7 = vadd.f32 %v289_v6, %v283_v5 }
  0x63   : > { %291 = vst [vmem:[%s282_s28] sm:$0xff] %v290_v7 }
  0x64   : > { %630 = shalt.err (!%p627_p7)
}
  0x65   : > { %s631_s15 = scalar_lea.hbm %s305_s8, 128  ;;  %s635_s22 = scalar_lea.hbm %s911_s3, 256 }
  0x66   : > { %p632_p1 = scmp.ne.s32.totalorder %s305_s8, %s631_s15  ;;  %p636_p3 = scmp.lt.s32.totalorder %s305_s8, %s911_s3 }
  0x67   : > { %p637_p8 = scmp.lt.s32.totalorder %s635_s22, %s631_s15 }
  0x68   : > { %p633_p10 = pnand %p632_p1, %p782_p9 }
  0x69   : > { %p638_p0 = por %p637_p8, %p636_p3 }
  0x6a   : > { %p634_p13 = pneg %p633_p10 }
  0x6c   : > { %p639_p12 = pnand %p638_p0, %p634_p13 }
  0x6e   : > { %642 = shalt.err (!%p639_p12)
}
  0x6f   : > { %464 = dma.vmem_to_hbm [thread:$0]  (%p782_p9), %s308_s18, 128, %s305_s8, %s293_s21  }
  0x70 PF: > { %s319_s4 = sand.u32 1, %s681_s12   ;;  %p922_p2 = scmp.ge.s32.totalorder %s701_s17, 2 }
  0x71   : > { %s320_s19 = scalar_lea.sflag [#allocation4], %s319_s4 }
  0x72   : > { %p477_p4 = pnand %p922_p2, %p789_p11 }
  0x74   : > { %p478_p5 = pneg %p477_p4 }
  0x76   : > { %676 = dma.done.wait (%p478_p5), %s320_s19, 128  }
  0x77   : > { %678 = vsyncadd (%p478_p5), %s320_s19, 4294967168  ;;  %s22_s17 = sadd.s32 1, %s701_s17   ;;  %s923_s12 = smov %s685_s13 }
  0x78   : > { %p19_p6 = scmp.ge.s32.totalorder %s22_s17, 4   ;;  %s924_s13 = smov %s689_s14 }
  0x79   : > { %s925_s14 = smov %s787_s26  ;;  %s926_s15 = smov %s697_s16 }
  0x7a   : > { %s927_s16 = smov %s929_s20  ;;  %21 = sbr.rel (!%p19_p6) target bundleno = 11 (0xb), region = 101 }
  0x7f   :  { %325 = vsyncpa [#allocation3], 1 }
  0x80   :  { %327 = vsyncpa [#allocation3 + $0x1], 1 }
  0x81   :  { %328 = vsyncpa [#allocation6], 1 }
  0x82   :  { %330 = vsyncpa [#allocation6 + $0x1], 1 }
  0x83   :  { %331 = vsyncpa [#allocation4], 1 }
  0x84   :  { %333 = vsyncpa [#allocation4 + $0x1], 1 }

</bundles_post_ra>
